<compile_context>
chip_gen: v6e
topology: v6e:2x2x1
jax: 0.10.0
libtpu: 0.0.40
codegen_flags: <defaults>
</compile_context>

<pallas_src>
import functools

import jax
import jax.numpy as jnp
from jax import lax
from jax.experimental import pallas as pl
from jax.experimental.pallas import tpu as pltpu

LANES = 128
SUBLANES = 8
DEFAULT_BLOCK_ROWS = 1024  # (2, 1024, 128) f32 ypred block = 1 MiB per buffer
NCORES = 2                 # parallel grid axis (sharded across TCs on megacore parts)


def _cdiv(a, b):
    return -(-a // b)


def _loss_kernel(yp_ref, yt_ref, sums_ref, cnt_ref,
                 acc_bce, acc_sqf, acc_sqt, acc_cnt,
                 *, weight, floor, n, block_rows, steps):
    c = pl.program_id(0)          # core / parallel slice
    i = pl.program_id(1)          # sequential step within the slice
    block_elems = block_rows * LANES
    # Global element offset of this block (unclamped; index maps clamp the DMA,
    # the mask below neutralizes any duplicated / out-of-range block).
    start = (c * steps + i) * block_elems

    @pl.when(i == 0)
    def _init():
        acc_bce[...] = jnp.zeros_like(acc_bce)
        acc_sqf[...] = jnp.zeros_like(acc_sqf)
        acc_sqt[...] = jnp.zeros_like(acc_sqt)
        acc_cnt[...] = jnp.zeros_like(acc_cnt)

    x = yp_ref[0]     # classification logits   (block_rows, 128)
    p1 = yp_ref[1]    # regression predictions  (block_rows, 128)
    y = yt_ref[...]   # regression targets      (block_rows, 128)

    def partials():
        flag = y > floor
        ycat = flag.astype(jnp.float32)
        # Numerically stable softplus(-x) = log(1 + exp(-x)).
        sp = jnp.log1p(jnp.exp(-jnp.abs(x))) + jnp.maximum(-x, 0.0)
        # BCEWithLogits(pos_weight=w) = w*y*sp + (1-y)*(x+sp)
        #                             = sp*(1 + (w-1)*ycat) + (1-ycat)*x
        bce = sp * (1.0 + (weight - 1.0) * ycat) + (1.0 - ycat) * x
        d = p1 - y
        sq = d * d
        return bce, sq, sq * ycat, flag

    def fold(acc, v):
        # (block_rows, 128) -> (8, 128): pure vreg VALU adds into a 1-vreg accumulator.
        acc[...] += v.reshape(block_rows // SUBLANES, SUBLANES, LANES).sum(axis=0)

    @pl.when(start + block_elems <= n)
    def _fast():
        # Interior block: every element is valid -> no iota / mask math at all.
        bce, sq, sqf, flag = partials()
        fold(acc_bce, bce)
        fold(acc_sqf, sqf)
        fold(acc_sqt, sq)
        fold(acc_cnt, flag.astype(jnp.int32))

    @pl.when(start + block_elems > n)
    def _tail():
        # Tail / duplicated block: mask padding and out-of-range rows.
        rem = n - start  # valid elements in this block (<= 0 for fully OOB blocks)
        row = lax.broadcasted_iota(jnp.int32, (block_rows, LANES), 0)
        lane = lax.broadcasted_iota(jnp.int32, (block_rows, LANES), 1)
        valid = (row * LANES + lane) < rem
        bce, sq, sqf, flag = partials()
        fold(acc_bce, jnp.where(valid, bce, 0.0))
        fold(acc_sqf, jnp.where(valid, sqf, 0.0))
        fold(acc_sqt, jnp.where(valid, sq, 0.0))
        fold(acc_cnt, (valid & flag).astype(jnp.int32))

    @pl.when(i == steps - 1)
    def _finalize():
        sums_ref[0, 0] = acc_bce[...]   # sum of per-element BCE terms
        sums_ref[0, 1] = acc_sqf[...]   # sum (p1 - y)^2 over flag
        sums_ref[0, 2] = acc_sqt[...]   # sum (p1 - y)^2 over all valid elements
        cnt_ref[0] = acc_cnt[...]       # flag count (int32, exact)


def regression_classification_loss(ypred, ytrue, weight=2.0, floor=-20.0,
                                   block_rows=DEFAULT_BLOCK_ROWS):
    ytrue = jnp.asarray(ytrue).reshape(-1).astype(jnp.float32)
    n = ytrue.shape[0]
    ypred = jnp.asarray(ypred)

    if ypred.shape == (n, 2):
        # Module layout: one fused transpose(+pad) pass to get planar planes.
        # TODO(synk): have the producer emit ypred as [2, N] to make this path zero-copy.
        yp_planes = ypred.astype(jnp.float32).T
    elif ypred.shape == (2, n):
        # Preferred producer layout: zero-copy when N is 128-aligned.
        yp_planes = ypred.astype(jnp.float32)
    else:
        raise ValueError(f"ypred must have shape ({n}, 2) or (2, {n}); got {ypred.shape}")

    r = _cdiv(n, LANES)                       # logical 128-lane rows
    br = min(int(block_rows), max(r, 1))
    br = max(SUBLANES, _cdiv(br, SUBLANES) * SUBLANES)   # multiple of 8
    nblocks = _cdiv(r, br)
    steps = _cdiv(nblocks, NCORES)
    pad = r * LANES - n                       # lane padding for the (r, 128) view

    yt = ytrue if pad == 0 else jnp.pad(ytrue, (0, pad))
    yt2d = yt.reshape(r, LANES)
    if pad:
        yp_planes = jnp.pad(yp_planes, ((0, 0), (0, pad)))
    yp3d = yp_planes.reshape(2, r, LANES)

    kernel = functools.partial(
        _loss_kernel, weight=float(weight), floor=float(floor),
        n=n, block_rows=br, steps=steps)

    def _row_blk(c, i):
        # Clamp so every DMA'd block starts inside the arrays; duplicated blocks
        # are fully masked in-kernel (their unclamped start is >= n).
        return jnp.minimum(c * steps + i, nblocks - 1)

    sums, cnts = pl.pallas_call(
        kernel,
        out_shape=(jax.ShapeDtypeStruct((NCORES, 3, SUBLANES, LANES), jnp.float32),
                   jax.ShapeDtypeStruct((NCORES, SUBLANES, LANES), jnp.int32)),
        grid_spec=pltpu.PrefetchScalarGridSpec(
            num_scalar_prefetch=0,
            grid=(NCORES, steps),
            in_specs=[
                pl.BlockSpec((2, br, LANES), lambda c, i: (0, _row_blk(c, i), 0)),
                pl.BlockSpec((br, LANES), lambda c, i: (_row_blk(c, i), 0)),
            ],
            out_specs=(
                pl.BlockSpec((1, 3, SUBLANES, LANES), lambda c, i: (c, 0, 0, 0)),
                pl.BlockSpec((1, SUBLANES, LANES), lambda c, i: (c, 0, 0)),
            ),
            scratch_shapes=[pltpu.VMEM((SUBLANES, LANES), jnp.float32)] * 3
                           + [pltpu.VMEM((SUBLANES, LANES), jnp.int32)],
        ),
        compiler_params=pltpu.CompilerParams(
            dimension_semantics=("parallel", "arbitrary")),
    )(yp3d, yt2d)

    # Tiny final reductions + the module's data-dependent branches on scalars.
    bce_sum = jnp.sum(sums[:, 0])
    sqf_sum = jnp.sum(sums[:, 1])
    sqt_sum = jnp.sum(sums[:, 2])
    nf_i = jnp.sum(cnts)                     # exact int32 flag count
    nf = nf_i.astype(jnp.float32)

    n_f = jnp.float32(n)
    class_err = bce_sum / n_f
    mse_flag = sqf_sum / jnp.maximum(nf, 1.0)
    sqnf_sum = sqt_sum - sqf_sum             # sum over ~flag = total - flagged
    mse_nflag = sqnf_sum / jnp.maximum(n_f - nf, 1.0)
    reg_err = jnp.where(
        nf_i > 0,
        weight * mse_flag + jnp.where(nf_i < n, mse_nflag, 0.0),
        0.0)
    return reg_err + class_err


def _ref_loss(ypred, ytrue, weight, floor):
    # Pure-JAX reference mirroring the PyTorch module (independent formulation).
    x = ypred[:, 0].astype(jnp.float32)
    p1 = ypred[:, 1].astype(jnp.float32)
    y = ytrue.astype(jnp.float32)
    flag = y > floor
    ycat = flag.astype(jnp.float32)
    sp = jnp.log1p(jnp.exp(-jnp.abs(x))) + jnp.maximum(-x, 0.0)
    class_err = jnp.mean(weight * ycat * sp + (1.0 - ycat) * (x + sp))
    n = y.shape[0]
    nf = jnp.sum(ycat)
    sq = (p1 - y) ** 2
    mse_f = jnp.sum(jnp.where(flag, sq, 0.0)) / jnp.maximum(nf, 1.0)
    mse_nf = jnp.sum(jnp.where(flag, 0.0, sq)) / jnp.maximum(n - nf, 1.0)
    reg = jnp.where(nf > 0, weight * mse_f + jnp.where(nf < n, mse_nf, 0.0), 0.0)
    return reg + class_err


if __name__ == "__main__":
    WEIGHT = 2.0
    FLOOR = -20.0

    def make_case(key, n, frac_below):
        k1, k2, k3 = jax.random.split(key, 3)
        yp = jax.random.normal(k1, (n, 2), dtype=jnp.float32)
        vals = 3.0 * jax.random.normal(k2, (n,), dtype=jnp.float32)
        yt = jnp.where(jax.random.uniform(k3, (n,)) < frac_below,
                       jnp.float32(-25.0), vals)
        return yp, yt

    # Case 1: small unaligned N (single partial block, masked tail path).
    yp1, yt1 = make_case(jax.random.PRNGKey(0), 300, 0.3)
    l1 = jax.block_until_ready(regression_classification_loss(yp1, yt1, WEIGHT, FLOOR))
    r1 = _ref_loss(yp1, yt1, WEIGHT, FLOOR)
    assert jnp.allclose(l1, r1, rtol=2e-4, atol=1e-4), (l1, r1)

    # Case 2: multi-block grid with tiny blocks (both parallel slices active,
    # fast path + masked tail + clamped duplicate block).
    yp2, yt2 = make_case(jax.random.PRNGKey(1), 3000, 0.3)
    l2 = jax.block_until_ready(
        regression_classification_loss(yp2, yt2, WEIGHT, FLOOR, block_rows=8))
    r2 = _ref_loss(yp2, yt2, WEIGHT, FLOOR)
    assert jnp.allclose(l2, r2, rtol=2e-4, atol=1e-4), (l2, r2)

    # Case 3: 128-aligned N with planar (2, N) ypred -> fully zero-copy input path.
    yp3, yt3 = make_case(jax.random.PRNGKey(2), 1024, 0.3)
    l3 = jax.block_until_ready(
        regression_classification_loss(yp3.T, yt3, WEIGHT, FLOOR, block_rows=8))
    r3 = _ref_loss(yp3, yt3, WEIGHT, FLOOR)
    assert jnp.allclose(l3, r3, rtol=2e-4, atol=1e-4), (l3, r3)

    # Case 4: all elements flagged (exercises the flag.sum() == len(flag) gate).
    k1, k2 = jax.random.split(jax.random.PRNGKey(3))
    yp4 = jax.random.normal(k1, (200, 2), dtype=jnp.float32)
    yt4 = jnp.abs(3.0 * jax.random.normal(k2, (200,), dtype=jnp.float32))
    l4 = jax.block_until_ready(regression_classification_loss(yp4, yt4, WEIGHT, FLOOR))
    r4 = _ref_loss(yp4, yt4, WEIGHT, FLOOR)
    assert jnp.allclose(l4, r4, rtol=2e-4, atol=1e-4), (l4, r4)

    print("KERNEL_OK")
</pallas_src>

<mosaic_0001>
module attributes {stable_mosaic.version = 11 : i64} {
  func.func @_loss_kernel(%arg0: i32, %arg1: i32, %arg2: memref<2x8x128xf32, #tpu.memory_space<vmem>>, %arg3: memref<8x128xf32, #tpu.memory_space<vmem>>, %arg4: memref<1x3x8x128xf32, #tpu.memory_space<vmem>>, %arg5: memref<1x8x128xi32, #tpu.memory_space<vmem>>, %arg6: memref<8x128xf32, #tpu.memory_space<vmem>>, %arg7: memref<8x128xf32, #tpu.memory_space<vmem>>, %arg8: memref<8x128xf32, #tpu.memory_space<vmem>>, %arg9: memref<8x128xi32, #tpu.memory_space<vmem>>) attributes {dimension_semantics = [#tpu.dimension_semantics<parallel>, #tpu.dimension_semantics<arbitrary>], iteration_bounds = array<i64: 2, 1>, scalar_prefetch = 0 : i64, scratch_operands = 4 : i64, tpu.core_type = #tpu.core_type<tc>, window_params = [{transform_indices = @transform_0, window_bounds = array<i64: 2, 8, 128>}, {transform_indices = @transform_1, window_bounds = array<i64: 8, 128>}, {transform_indices = @transform_2, window_bounds = array<i64: 1, 3, 8, 128>}, {transform_indices = @transform_3, window_bounds = array<i64: 1, 8, 128>}]} {
    %c1_i32 = arith.constant 1 : i32
    %0 = arith.muli %arg0, %c1_i32 : i32
    %1 = arith.addi %0, %arg1 : i32
    %c1024_i32 = arith.constant 1024 : i32
    %2 = arith.muli %1, %c1024_i32 : i32
    %c0_i32 = arith.constant 0 : i32
    %3 = arith.cmpi eq, %arg1, %c0_i32 : i32
    %4 = arith.extui %3 : i1 to i32
    %c0_i32_0 = arith.constant 0 : i32
    %5 = arith.cmpi ne, %4, %c0_i32_0 : i32
    scf.if %5 {
      %cst = arith.constant 0.000000e+00 : f32
      %22 = vector.broadcast %cst : f32 to vector<8x128xf32>
      %c0_14 = arith.constant 0 : index
      %c0_15 = arith.constant 0 : index
      %23 = vector.load %arg6[%c0_14, %c0_15] : memref<8x128xf32, #tpu.memory_space<vmem>>, vector<8x128xf32>
      tpu.vector_store %arg6[%c0_14, %c0_15], %22 {strides = array<i32>} : memref<8x128xf32, #tpu.memory_space<vmem>>, vector<8x128xf32>,
      %cst_16 = arith.constant 0.000000e+00 : f32
      %24 = vector.broadcast %cst_16 : f32 to vector<8x128xf32>
      %c0_17 = arith.constant 0 : index
      %c0_18 = arith.constant 0 : index
      %25 = vector.load %arg7[%c0_17, %c0_18] : memref<8x128xf32, #tpu.memory_space<vmem>>, vector<8x128xf32>
      tpu.vector_store %arg7[%c0_17, %c0_18], %24 {strides = array<i32>} : memref<8x128xf32, #tpu.memory_space<vmem>>, vector<8x128xf32>,
      %cst_19 = arith.constant 0.000000e+00 : f32
      %26 = vector.broadcast %cst_19 : f32 to vector<8x128xf32>
      %c0_20 = arith.constant 0 : index
      %c0_21 = arith.constant 0 : index
      %27 = vector.load %arg8[%c0_20, %c0_21] : memref<8x128xf32, #tpu.memory_space<vmem>>, vector<8x128xf32>
      tpu.vector_store %arg8[%c0_20, %c0_21], %26 {strides = array<i32>} : memref<8x128xf32, #tpu.memory_space<vmem>>, vector<8x128xf32>,
      %c0_i32_22 = arith.constant 0 : i32
      %28 = vector.broadcast %c0_i32_22 : i32 to vector<8x128xi32>
      %c0_23 = arith.constant 0 : index
      %c0_24 = arith.constant 0 : index
      %29 = vector.load %arg9[%c0_23, %c0_24] : memref<8x128xi32, #tpu.memory_space<vmem>>, vector<8x128xi32>
      tpu.vector_store %arg9[%c0_23, %c0_24], %28 {strides = array<i32>} : memref<8x128xi32, #tpu.memory_space<vmem>>, vector<8x128xi32>,
    } else {
    }
    %c0 = arith.constant 0 : index
    %c0_1 = arith.constant 0 : index
    %c0_2 = arith.constant 0 : index
    %6 = vector.load %arg2[%c0, %c0_1, %c0_2] : memref<2x8x128xf32, #tpu.memory_space<vmem>>, vector<1x8x128xf32>
    %7 = vector.shape_cast %6 : vector<1x8x128xf32> to vector<8x128xf32>
    %c1 = arith.constant 1 : index
    %c0_3 = arith.constant 0 : index
    %c0_4 = arith.constant 0 : index
    %8 = vector.load %arg2[%c1, %c0_3, %c0_4] : memref<2x8x128xf32, #tpu.memory_space<vmem>>, vector<1x8x128xf32>
    %9 = vector.shape_cast %8 : vector<1x8x128xf32> to vector<8x128xf32>
    %c0_5 = arith.constant 0 : index
    %c0_6 = arith.constant 0 : index
    %10 = vector.load %arg3[%c0_5, %c0_6] : memref<8x128xf32, #tpu.memory_space<vmem>>, vector<8x128xf32>
    %c1024_i32_7 = arith.constant 1024 : i32
    %11 = arith.addi %2, %c1024_i32_7 : i32
    %c300_i32 = arith.constant 300 : i32
    %12 = arith.cmpi sle, %11, %c300_i32 : i32
    %13 = arith.extui %12 : i1 to i32
    %c0_i32_8 = arith.constant 0 : i32
    %14 = arith.cmpi ne, %13, %c0_i32_8 : i32
    scf.if %14 {
      %cst = arith.constant -2.000000e+01 : f32
      %22 = vector.broadcast %cst : f32 to vector<8x128xf32>
      %23 = arith.cmpf ogt, %10, %22 : vector<8x128xf32>
      %24 = arith.extui %23 : vector<8x128xi1> to vector<8x128xi32>
      %25 = arith.sitofp %24 : vector<8x128xi32> to vector<8x128xf32>
      %26 = math.absf %7 : vector<8x128xf32>
      %cst_14 = arith.constant 0.000000e+00 : f32
      %27 = vector.broadcast %cst_14 : f32 to vector<8x128xf32>
      %28 = arith.subf %27, %26 : vector<8x128xf32>
      %29 = math.exp %28 : vector<8x128xf32>
      %30 = math.log1p %29 : vector<8x128xf32>
      %cst_15 = arith.constant 0.000000e+00 : f32
      %31 = vector.broadcast %cst_15 : f32 to vector<8x128xf32>
      %32 = arith.subf %31, %7 : vector<8x128xf32>
      %cst_16 = arith.constant 0.000000e+00 : f32
      %33 = vector.broadcast %cst_16 : f32 to vector<8x128xf32>
      %34 = arith.maximumf %32, %33 : vector<8x128xf32>
      %35 = arith.addf %30, %34 : vector<8x128xf32>
      %cst_17 = arith.constant 1.000000e+00 : f32
      %36 = vector.broadcast %cst_17 : f32 to vector<8x128xf32>
      %37 = arith.mulf %36, %25 : vector<8x128xf32>
      %cst_18 = arith.constant 1.000000e+00 : f32
      %38 = vector.broadcast %cst_18 : f32 to vector<8x128xf32>
      %39 = arith.addf %38, %37 : vector<8x128xf32>
      %40 = arith.mulf %35, %39 : vector<8x128xf32>
      %cst_19 = arith.constant 1.000000e+00 : f32
      %41 = vector.broadcast %cst_19 : f32 to vector<8x128xf32>
      %42 = arith.subf %41, %25 : vector<8x128xf32>
      %43 = arith.mulf %42, %7 : vector<8x128xf32>
      %44 = arith.addf %40, %43 : vector<8x128xf32>
      %45 = arith.subf %9, %10 : vector<8x128xf32>
      %46 = arith.mulf %45, %45 : vector<8x128xf32>
      %47 = arith.mulf %46, %25 : vector<8x128xf32>
      %c0_20 = arith.constant 0 : index
      %c0_21 = arith.constant 0 : index
      %48 = vector.load %arg6[%c0_20, %c0_21] : memref<8x128xf32, #tpu.memory_space<vmem>>, vector<8x128xf32>
      %49 = vector.shape_cast %44 : vector<8x128xf32> to vector<1x8x128xf32>
      %cst_22 = arith.constant dense<0.000000e+00> : vector<8x128xf32>
      %50 = vector.multi_reduction <add>, %49, %cst_22 [0] : vector<1x8x128xf32> to vector<8x128xf32>
      %51 = arith.addf %48, %50 : vector<8x128xf32>
      %c0_23 = arith.constant 0 : index
      %c0_24 = arith.constant 0 : index
      %52 = vector.load %arg6[%c0_23, %c0_24] : memref<8x128xf32, #tpu.memory_space<vmem>>, vector<8x128xf32>
      tpu.vector_store %arg6[%c0_23, %c0_24], %51 {strides = array<i32>} : memref<8x128xf32, #tpu.memory_space<vmem>>, vector<8x128xf32>,
      %c0_25 = arith.constant 0 : index
      %c0_26 = arith.constant 0 : index
      %53 = vector.load %arg7[%c0_25, %c0_26] : memref<8x128xf32, #tpu.memory_space<vmem>>, vector<8x128xf32>
      %54 = vector.shape_cast %47 : vector<8x128xf32> to vector<1x8x128xf32>
      %cst_27 = arith.constant dense<0.000000e+00> : vector<8x128xf32>
      %55 = vector.multi_reduction <add>, %54, %cst_27 [0] : vector<1x8x128xf32> to vector<8x128xf32>
      %56 = arith.addf %53, %55 : vector<8x128xf32>
      %c0_28 = arith.constant 0 : index
      %c0_29 = arith.constant 0 : index
      %57 = vector.load %arg7[%c0_28, %c0_29] : memref<8x128xf32, #tpu.memory_space<vmem>>, vector<8x128xf32>
      tpu.vector_store %arg7[%c0_28, %c0_29], %56 {strides = array<i32>} : memref<8x128xf32, #tpu.memory_space<vmem>>, vector<8x128xf32>,
      %c0_30 = arith.constant 0 : index
      %c0_31 = arith.constant 0 : index
      %58 = vector.load %arg8[%c0_30, %c0_31] : memref<8x128xf32, #tpu.memory_space<vmem>>, vector<8x128xf32>
      %59 = vector.shape_cast %46 : vector<8x128xf32> to vector<1x8x128xf32>
      %cst_32 = arith.constant dense<0.000000e+00> : vector<8x128xf32>
      %60 = vector.multi_reduction <add>, %59, %cst_32 [0] : vector<1x8x128xf32> to vector<8x128xf32>
      %61 = arith.addf %58, %60 : vector<8x128xf32>
      %c0_33 = arith.constant 0 : index
      %c0_34 = arith.constant 0 : index
      %62 = vector.load %arg8[%c0_33, %c0_34] : memref<8x128xf32, #tpu.memory_space<vmem>>, vector<8x128xf32>
      tpu.vector_store %arg8[%c0_33, %c0_34], %61 {strides = array<i32>} : memref<8x128xf32, #tpu.memory_space<vmem>>, vector<8x128xf32>,
      %63 = arith.extui %23 : vector<8x128xi1> to vector<8x128xi32>
      %c0_35 = arith.constant 0 : index
      %c0_36 = arith.constant 0 : index
      %64 = vector.load %arg9[%c0_35, %c0_36] : memref<8x128xi32, #tpu.memory_space<vmem>>, vector<8x128xi32>
      %65 = vector.shape_cast %63 : vector<8x128xi32> to vector<1x8x128xi32>
      %cst_37 = arith.constant dense<0> : vector<8x128xi32>
      %66 = vector.multi_reduction <add>, %65, %cst_37 [0] : vector<1x8x128xi32> to vector<8x128xi32>
      %67 = arith.addi %64, %66 : vector<8x128xi32>
      %c0_38 = arith.constant 0 : index
      %c0_39 = arith.constant 0 : index
      %68 = vector.load %arg9[%c0_38, %c0_39] : memref<8x128xi32, #tpu.memory_space<vmem>>, vector<8x128xi32>
      tpu.vector_store %arg9[%c0_38, %c0_39], %67 {strides = array<i32>} : memref<8x128xi32, #tpu.memory_space<vmem>>, vector<8x128xi32>,
    } else {
    }
    %c1024_i32_9 = arith.constant 1024 : i32
    %15 = arith.addi %2, %c1024_i32_9 : i32
    %c300_i32_10 = arith.constant 300 : i32
    %16 = arith.cmpi sgt, %15, %c300_i32_10 : i32
    %17 = arith.extui %16 : i1 to i32
    %c0_i32_11 = arith.constant 0 : i32
    %18 = arith.cmpi ne, %17, %c0_i32_11 : i32
    scf.if %18 {
      %c300_i32_14 = arith.constant 300 : i32
      %22 = arith.subi %c300_i32_14, %2 : i32
      %23 = tpu.iota {dimensions = array<i32: 0>} : vector<8x128xi32>
      %24 = tpu.iota {dimensions = array<i32: 1>} : vector<8x128xi32>
      %c128_i32 = arith.constant 128 : i32
      %25 = vector.broadcast %c128_i32 : i32 to vector<8x128xi32>
      %26 = arith.muli %23, %25 : vector<8x128xi32>
      %27 = arith.addi %26, %24 : vector<8x128xi32>
      %28 = vector.broadcast %22 : i32 to vector<8x128xi32>
      %29 = arith.cmpi slt, %27, %28 : vector<8x128xi32>
      %cst = arith.constant -2.000000e+01 : f32
      %30 = vector.broadcast %cst : f32 to vector<8x128xf32>
      %31 = arith.cmpf ogt, %10, %30 : vector<8x128xf32>
      %32 = arith.extui %31 : vector<8x128xi1> to vector<8x128xi32>
      %33 = arith.sitofp %32 : vector<8x128xi32> to vector<8x128xf32>
      %34 = math.absf %7 : vector<8x128xf32>
      %cst_15 = arith.constant 0.000000e+00 : f32
      %35 = vector.broadcast %cst_15 : f32 to vector<8x128xf32>
      %36 = arith.subf %35, %34 : vector<8x128xf32>
      %37 = math.exp %36 : vector<8x128xf32>
      %38 = math.log1p %37 : vector<8x128xf32>
      %cst_16 = arith.constant 0.000000e+00 : f32
      %39 = vector.broadcast %cst_16 : f32 to vector<8x128xf32>
      %40 = arith.subf %39, %7 : vector<8x128xf32>
      %cst_17 = arith.constant 0.000000e+00 : f32
      %41 = vector.broadcast %cst_17 : f32 to vector<8x128xf32>
      %42 = arith.maximumf %40, %41 : vector<8x128xf32>
      %43 = arith.addf %38, %42 : vector<8x128xf32>
      %cst_18 = arith.constant 1.000000e+00 : f32
      %44 = vector.broadcast %cst_18 : f32 to vector<8x128xf32>
      %45 = arith.mulf %44, %33 : vector<8x128xf32>
      %cst_19 = arith.constant 1.000000e+00 : f32
      %46 = vector.broadcast %cst_19 : f32 to vector<8x128xf32>
      %47 = arith.addf %46, %45 : vector<8x128xf32>
      %48 = arith.mulf %43, %47 : vector<8x128xf32>
      %cst_20 = arith.constant 1.000000e+00 : f32
      %49 = vector.broadcast %cst_20 : f32 to vector<8x128xf32>
      %50 = arith.subf %49, %33 : vector<8x128xf32>
      %51 = arith.mulf %50, %7 : vector<8x128xf32>
      %52 = arith.addf %48, %51 : vector<8x128xf32>
      %53 = arith.subf %9, %10 : vector<8x128xf32>
      %54 = arith.mulf %53, %53 : vector<8x128xf32>
      %55 = arith.mulf %54, %33 : vector<8x128xf32>
      %cst_21 = arith.constant 0.000000e+00 : f32
      %56 = vector.broadcast %cst_21 : f32 to vector<8x128xf32>
      %57 = arith.select %29, %52, %56 : vector<8x128xi1>, vector<8x128xf32>
      %c0_22 = arith.constant 0 : index
      %c0_23 = arith.constant 0 : index
      %58 = vector.load %arg6[%c0_22, %c0_23] : memref<8x128xf32, #tpu.memory_space<vmem>>, vector<8x128xf32>
      %59 = vector.shape_cast %57 : vector<8x128xf32> to vector<1x8x128xf32>
      %cst_24 = arith.constant dense<0.000000e+00> : vector<8x128xf32>
      %60 = vector.multi_reduction <add>, %59, %cst_24 [0] : vector<1x8x128xf32> to vector<8x128xf32>
      %61 = arith.addf %58, %60 : vector<8x128xf32>
      %c0_25 = arith.constant 0 : index
      %c0_26 = arith.constant 0 : index
      %62 = vector.load %arg6[%c0_25, %c0_26] : memref<8x128xf32, #tpu.memory_space<vmem>>, vector<8x128xf32>
      tpu.vector_store %arg6[%c0_25, %c0_26], %61 {strides = array<i32>} : memref<8x128xf32, #tpu.memory_space<vmem>>, vector<8x128xf32>,
      %cst_27 = arith.constant 0.000000e+00 : f32
      %63 = vector.broadcast %cst_27 : f32 to vector<8x128xf32>
      %64 = arith.select %29, %55, %63 : vector<8x128xi1>, vector<8x128xf32>
      %c0_28 = arith.constant 0 : index
      %c0_29 = arith.constant 0 : index
      %65 = vector.load %arg7[%c0_28, %c0_29] : memref<8x128xf32, #tpu.memory_space<vmem>>, vector<8x128xf32>
      %66 = vector.shape_cast %64 : vector<8x128xf32> to vector<1x8x128xf32>
      %cst_30 = arith.constant dense<0.000000e+00> : vector<8x128xf32>
      %67 = vector.multi_reduction <add>, %66, %cst_30 [0] : vector<1x8x128xf32> to vector<8x128xf32>
      %68 = arith.addf %65, %67 : vector<8x128xf32>
      %c0_31 = arith.constant 0 : index
      %c0_32 = arith.constant 0 : index
      %69 = vector.load %arg7[%c0_31, %c0_32] : memref<8x128xf32, #tpu.memory_space<vmem>>, vector<8x128xf32>
      tpu.vector_store %arg7[%c0_31, %c0_32], %68 {strides = array<i32>} : memref<8x128xf32, #tpu.memory_space<vmem>>, vector<8x128xf32>,
      %cst_33 = arith.constant 0.000000e+00 : f32
      %70 = vector.broadcast %cst_33 : f32 to vector<8x128xf32>
      %71 = arith.select %29, %54, %70 : vector<8x128xi1>, vector<8x128xf32>
      %c0_34 = arith.constant 0 : index
      %c0_35 = arith.constant 0 : index
      %72 = vector.load %arg8[%c0_34, %c0_35] : memref<8x128xf32, #tpu.memory_space<vmem>>, vector<8x128xf32>
      %73 = vector.shape_cast %71 : vector<8x128xf32> to vector<1x8x128xf32>
      %cst_36 = arith.constant dense<0.000000e+00> : vector<8x128xf32>
      %74 = vector.multi_reduction <add>, %73, %cst_36 [0] : vector<1x8x128xf32> to vector<8x128xf32>
      %75 = arith.addf %72, %74 : vector<8x128xf32>
      %c0_37 = arith.constant 0 : index
      %c0_38 = arith.constant 0 : index
      %76 = vector.load %arg8[%c0_37, %c0_38] : memref<8x128xf32, #tpu.memory_space<vmem>>, vector<8x128xf32>
      tpu.vector_store %arg8[%c0_37, %c0_38], %75 {strides = array<i32>} : memref<8x128xf32, #tpu.memory_space<vmem>>, vector<8x128xf32>,
      %77 = arith.andi %29, %31 : vector<8x128xi1>
      %78 = arith.extui %77 : vector<8x128xi1> to vector<8x128xi32>
      %c0_39 = arith.constant 0 : index
      %c0_40 = arith.constant 0 : index
      %79 = vector.load %arg9[%c0_39, %c0_40] : memref<8x128xi32, #tpu.memory_space<vmem>>, vector<8x128xi32>
      %80 = vector.shape_cast %78 : vector<8x128xi32> to vector<1x8x128xi32>
      %cst_41 = arith.constant dense<0> : vector<8x128xi32>
      %81 = vector.multi_reduction <add>, %80, %cst_41 [0] : vector<1x8x128xi32> to vector<8x128xi32>
      %82 = arith.addi %79, %81 : vector<8x128xi32>
      %c0_42 = arith.constant 0 : index
      %c0_43 = arith.constant 0 : index
      %83 = vector.load %arg9[%c0_42, %c0_43] : memref<8x128xi32, #tpu.memory_space<vmem>>, vector<8x128xi32>
      tpu.vector_store %arg9[%c0_42, %c0_43], %82 {strides = array<i32>} : memref<8x128xi32, #tpu.memory_space<vmem>>, vector<8x128xi32>,
    } else {
    }
    %c0_i32_12 = arith.constant 0 : i32
    %19 = arith.cmpi eq, %arg1, %c0_i32_12 : i32
    %20 = arith.extui %19 : i1 to i32
    %c0_i32_13 = arith.constant 0 : i32
    %21 = arith.cmpi ne, %20, %c0_i32_13 : i32
    scf.if %21 {
      %c0_14 = arith.constant 0 : index
      %c0_15 = arith.constant 0 : index
      %22 = vector.load %arg6[%c0_14, %c0_15] : memref<8x128xf32, #tpu.memory_space<vmem>>, vector<8x128xf32>
      %c0_16 = arith.constant 0 : index
      %c0_17 = arith.constant 0 : index
      %c0_18 = arith.constant 0 : index
      %c0_19 = arith.constant 0 : index
      %23 = vector.load %arg4[%c0_16, %c0_17, %c0_18, %c0_19] : memref<1x3x8x128xf32, #tpu.memory_space<vmem>>, vector<1x1x8x128xf32>
      %24 = vector.shape_cast %23 : vector<1x1x8x128xf32> to vector<8x128xf32>
      %25 = vector.shape_cast %22 : vector<8x128xf32> to vector<1x1x8x128xf32>
      tpu.vector_store %arg4[%c0_16, %c0_17, %c0_18, %c0_19], %25 {strides = array<i32>} : memref<1x3x8x128xf32, #tpu.memory_space<vmem>>, vector<1x1x8x128xf32>,
      %c0_20 = arith.constant 0 : index
      %c0_21 = arith.constant 0 : index
      %26 = vector.load %arg7[%c0_20, %c0_21] : memref<8x128xf32, #tpu.memory_space<vmem>>, vector<8x128xf32>
      %c0_22 = arith.constant 0 : index
      %c1_23 = arith.constant 1 : index
      %c0_24 = arith.constant 0 : index
      %c0_25 = arith.constant 0 : index
      %27 = vector.load %arg4[%c0_22, %c1_23, %c0_24, %c0_25] : memref<1x3x8x128xf32, #tpu.memory_space<vmem>>, vector<1x1x8x128xf32>
      %28 = vector.shape_cast %27 : vector<1x1x8x128xf32> to vector<8x128xf32>
      %29 = vector.shape_cast %26 : vector<8x128xf32> to vector<1x1x8x128xf32>
      tpu.vector_store %arg4[%c0_22, %c1_23, %c0_24, %c0_25], %29 {strides = array<i32>} : memref<1x3x8x128xf32, #tpu.memory_space<vmem>>, vector<1x1x8x128xf32>,
      %c0_26 = arith.constant 0 : index
      %c0_27 = arith.constant 0 : index
      %30 = vector.load %arg8[%c0_26, %c0_27] : memref<8x128xf32, #tpu.memory_space<vmem>>, vector<8x128xf32>
      %c0_28 = arith.constant 0 : index
      %c2 = arith.constant 2 : index
      %c0_29 = arith.constant 0 : index
      %c0_30 = arith.constant 0 : index
      %31 = vector.load %arg4[%c0_28, %c2, %c0_29, %c0_30] : memref<1x3x8x128xf32, #tpu.memory_space<vmem>>, vector<1x1x8x128xf32>
      %32 = vector.shape_cast %31 : vector<1x1x8x128xf32> to vector<8x128xf32>
      %33 = vector.shape_cast %30 : vector<8x128xf32> to vector<1x1x8x128xf32>
      tpu.vector_store %arg4[%c0_28, %c2, %c0_29, %c0_30], %33 {strides = array<i32>} : memref<1x3x8x128xf32, #tpu.memory_space<vmem>>, vector<1x1x8x128xf32>,
      %c0_31 = arith.constant 0 : index
      %c0_32 = arith.constant 0 : index
      %34 = vector.load %arg9[%c0_31, %c0_32] : memref<8x128xi32, #tpu.memory_space<vmem>>, vector<8x128xi32>
      %c0_33 = arith.constant 0 : index
      %c0_34 = arith.constant 0 : index
      %c0_35 = arith.constant 0 : index
      %35 = vector.load %arg5[%c0_33, %c0_34, %c0_35] : memref<1x8x128xi32, #tpu.memory_space<vmem>>, vector<1x8x128xi32>
      %36 = vector.shape_cast %35 : vector<1x8x128xi32> to vector<8x128xi32>
      %37 = vector.shape_cast %34 : vector<8x128xi32> to vector<1x8x128xi32>
      tpu.vector_store %arg5[%c0_33, %c0_34, %c0_35], %37 {strides = array<i32>} : memref<1x8x128xi32, #tpu.memory_space<vmem>>, vector<1x8x128xi32>,
    } else {
    }
    return
  }
  func.func @transform_0(%arg0: i32, %arg1: i32) -> (i32, i32, i32) {
    %c1_i32 = arith.constant 1 : i32
    %0 = arith.muli %arg0, %c1_i32 : i32
    %1 = arith.addi %0, %arg1 : i32
    %c0_i32 = arith.constant 0 : i32
    %2 = arith.minsi %1, %c0_i32 : i32
    %c0_i32_0 = arith.constant 0 : i32
    %c0_i32_1 = arith.constant 0 : i32
    %c0_i32_2 = arith.constant 0 : i32
    return %c0_i32_0, %2, %c0_i32_1 : i32, i32, i32
  }
  func.func @transform_1(%arg0: i32, %arg1: i32) -> (i32, i32) {
    %c1_i32 = arith.constant 1 : i32
    %0 = arith.muli %arg0, %c1_i32 : i32
    %1 = arith.addi %0, %arg1 : i32
    %c0_i32 = arith.constant 0 : i32
    %2 = arith.minsi %1, %c0_i32 : i32
    %c0_i32_0 = arith.constant 0 : i32
    %c0_i32_1 = arith.constant 0 : i32
    return %2, %c0_i32_0 : i32, i32
  }
  func.func @transform_2(%arg0: i32, %arg1: i32) -> (i32, i32, i32, i32) {
    %c0_i32 = arith.constant 0 : i32
    %c0_i32_0 = arith.constant 0 : i32
    %c0_i32_1 = arith.constant 0 : i32
    %c0_i32_2 = arith.constant 0 : i32
    return %arg0, %c0_i32, %c0_i32_0, %c0_i32_1 : i32, i32, i32, i32
  }
  func.func @transform_3(%arg0: i32, %arg1: i32) -> (i32, i32, i32) {
    %c0_i32 = arith.constant 0 : i32
    %c0_i32_0 = arith.constant 0 : i32
    %c0_i32_1 = arith.constant 0 : i32
    return %arg0, %c0_i32, %c0_i32_0 : i32, i32, i32
  }
}

</mosaic_0001>

<bundles_post_ra>
// kernel: tpu_custom_call.1
= control target key start
LH: loop header
LB: loop body
LE: loop exit
PB: predicated region body
PF: predicated region fallthrough
CT: control target
= control target key end

     0   :  { %9 = vsyncpa [#allocation8], 0  ;;  %s1193_s0 = inlined_call_operand.vmem [shape: f32[2,3,128], index: 0, kind: input, shape index: {}]   ;;  %s1194_s1 = inlined_call_operand.vmem [shape: f32[3,128], index: 1, kind: input, shape index: {}]   ;;  %s1195_s2 = inlined_call_operand.hbm [shape: f32[2,3,8,128], index: 2, kind: output, shape index: {0}]   ;;  %s1196_s3 = inlined_call_operand.hbm [shape: s32[2,8,128], index: 3, kind: output, shape index: {1}]  }
   0x1   :  { %11 = vsyncpa [#allocation8 + $0x1], 0 }
   0x2   :  { %12 = vsyncpa [#allocation10], 0 }
   0x3   :  { %14 = vsyncpa [#allocation10 + $0x1], 0  ;;  %s985_s12 = smov 0   ;;  %s987_s13 = smov 0  }
   0x4   :  { %s989_s14 = smov 0   ;;  %s991_s15 = smov 0  }
   0x5   :  { %s993_s16 = smov 0   ;;  %s995_s17 = smov 0  }
   0x6   :  { %s997_s18 = smov 0  }
   0x7 LB: > { %s644_s19 = sadd.s32 4294967295, %s937_s18   ;;  %s645_s20 = sadd.s32 4294967294, %s937_s18   ;;  %s937_s18 = sphi %s997_s18, %s20_s18   ;;  %s933_s17 = sphi %s995_s17, %s1207_s17   ;;  %s929_s16 = sphi %s993_s16, %s1206_s16   ;;  %s925_s15 = sphi %s991_s15, %s1183_s15   ;;  %s921_s14 = sphi %s989_s14, %s1205_s14   ;;  %s917_s13 = sphi %s987_s13, %s1204_s13   ;;  %s913_s12 = sphi %s985_s12, %s1203_s12  }
   0x8   : > { %s32_s21 = sadd.s32 1, %s933_s17  ;;  %p910_p1 = scmp.ne.s32.totalorder %s925_s15, 0 }
   0x9   : > { %p34_p0 = scmp.ge.s32.totalorder %s32_s21, 2  ;;  %p53_p2 = scmp.eq.s32.totalorder %s937_s18, 0 }
   0xa   : > { %s103_s23 = sadd.s32 1, %s921_s14  ;;  %p113_p5 = scmp.ne.s32.totalorder %s921_s14, %s917_s13 }
   0xb   : > { %s1209_s21 = smov (%p34_p0, %s32_s21), 0  ;;  %p54_p3 = por %p910_p1, %p53_p2 }
   0xc   : > { %s100_s22 = ssub.s32 %s933_s17, %s1209_s21  ;;  %p114_p6 = scmp.eq.s32.totalorder %s644_s19, 1 }
   0xd   : > { %p101_p4 = scmp.eq.s32.totalorder %s100_s22, 0  ;;  %p119_p7 = scmp.ne.s32.totalorder %s917_s13, %s913_s12 }
   0xe   : > { %p1037_p8 = por %p114_p6, %p113_p5  ;;  %p120_p9 = scmp.eq.s32.totalorder %s645_s20, 1 }
   0xf   : > { %s1035_s24 = scalar_select %p101_p4, %s921_s14, %s103_s23  }
  0x10   : > { %p1041_p10 = por %p120_p9, %p119_p7  ;;  %p1197_p11 = scmp.ge.s32.totalorder %s937_s18, 2 }
  0x12   : > { %162 = sbr.rel (%p1197_p11) target bundleno = 36 (0x24), region = 16 }
  0x17   : > { %165 = sbr.rel (!%p54_p3) target bundleno = 36 (0x24), region = 20  ;;  %s939_s27 = smov (%p54_p3), [#allocation6]  }
  0x18   : > { %s943_s30 = smov (%p54_p3), %s1193_s0   ;;  %s947_s4 = smov (%p54_p3), 0  }
  0x19   : > { %s951_s5 = smov (%p54_p3), 0  }
  0x1c LB: >> { %v197_v0 = vld [vmem:[%s945_s30] sm:$0xf]  ;;  %v199_v1 = vld [vmem:[%s945_s30 + $0x4] sm:$0xf]  ;;  %s201_s6 = sadd.s32 1, %s949_s4  ;;  %s191_s5 = sadd.s32 1, %s953_s5   ;;  %s953_s5 = sphi %s951_s5, %s191_s5   ;;  %s949_s4 = sphi %s947_s4, %s948_s4   ;;  %s945_s30 = sphi %s943_s30, %s206_s30   ;;  %s941_s27 = sphi %s939_s27, %s207_s27  }
  0x1d   : >> { %198 = vst [vmem:[%s941_s27] sm:$0xf] %v197_v0  ;;  %200 = vst [vmem:[%s941_s27 + $0x8] sm:$0xf] %v199_v1  ;;  %p202_p12 = scmp.ge.s32.totalorder %s201_s6, 1  ;;  %p190_p13 = scmp.ge.s32.totalorder %s191_s5, 1 }
  0x1f   : >> { %s1211_s6 = smov (%p202_p12, %s201_s6), 0  ;;  %193 = sbr.rel (!%p190_p13) target bundleno = 28 (0x1c), region = 150 }
  0x20   : >> { %s655_s7 = sshll.u32 %s1211_s6, 2  ;;  %s948_s4 = smov %s1211_s6  }
  0x21   : >> { %s206_s30 = scalar_lea.vmem %s1193_s0, %s655_s7   ;;  %s207_s27 = scalar_lea.vmem [#allocation6], %s655_s7  }
  0x24 PF: > { %p657_p0 = scmp.ge.s32.totalorder %s937_s18, 1  ;;  %p269_p1 = scmp.lt.s32.totalorder %s937_s18, 3 }
  0x26   : > { %p270_p2 = pnand %p657_p0, %p269_p1 }
  0x27   : > { %s276_s10 = sand.u32 (!%p270_p2), 1, %s925_s15   ;;  %s1058_s11 = sand.u32 (!%p270_p2), 1, %s917_s13  }
  0x28   : > { %273 = sbr.rel (%p270_p2) target bundleno = 206 (0xce), region = 65  ;;  %s658_s19 = sshll.u32 (!%p270_p2), %s276_s10, 4 }
  0x29   : > { %s676_s20 = smul.u32 (!%p270_p2), 24, %s1058_s11  ;;  %s659_s22 = sshll.u32 (!%p270_p2), %s1058_s11, 3 }
  0x2a   : > { %s278_s23 = scalar_lea.vmem (!%p270_p2), [#allocation6], %s658_s19  ;;  %p321_p3 = scmp.lt.s32.totalorder (!%p270_p2), %s929_s16, 0 }
  0x2b   : > { %s662_s15 = sshll.u32 (!%p270_p2), %s929_s16, 10  ;;  %s1078_s7 = scalar_lea.vmem (!%p270_p2), [#allocation7], %s676_s20 }
  0x2c   : > { %s1070_s27 = sadd.s32 (!%p270_p2), 1024, %s662_s15  ;;  %s1080_s8 = scalar_lea.vmem (!%p270_p2), [#allocation9], %s659_s22 }
  0x2d   : > { %v955_v2 = vmov 0.0   ;;  %v956_v3 = vmov 0   ;;  %v1062_v4 = vld [vmem:[%s278_s23] sm:$0xff]  ;;  %v1064_v5 = vld [vmem:[%s278_s23 + $0x8] sm:$0xff]  ;;  %s322_s28 = scalar_select %p321_p3, %s929_s16, 0 }
  0x2e   : > { %342 = vst [vmem:[#allocation2] sm:$0xff] %v955_v2  ;;  %343 = vst [vmem:[#allocation3] sm:$0xff] %v955_v2  ;;  %p664_p5 = scmp.gt.s32.totalorder %s1070_s27, 300 }
  0x2f   : > { %344 = vst [vmem:[#allocation4] sm:$0xff] %v955_v2  ;;  %345 = vst [vmem:[#allocation5] sm:$0xff] %v956_v3  ;;  %s660_s29 = sshll.u32 %s322_s28, 1 }
  0x30   : > { %p326_p4 = scmp.lt.s32.totalorder %s660_s29, 0 }
  0x31   : > { %354 = sbr.rel (%p664_p5) target bundleno = 102 (0x66), region = 77 }
  0x32   : > { %s1213_s29 = smov (!%p326_p4, %s660_s29), 0 }
  0x33   : > { %s661_s30 = sshll.u32 %s1213_s29, 2 }
  0x34   : > { %s329_s6 = scalar_lea.vmem %s1194_s1, %s661_s30 }
  0x35   : > { %v1076_v6 = vld [vmem:[%s329_s6] sm:$0xff] }
  0x36   : > { %v358_v7 = vand.u32 2147483647, %v1062_v4  ;;  %vm355_vm0 = vcmp.gt.f32.partialorder %v1076_v6, -20.0  ;;  %v379_v8 = vsub.f32 %v1064_v5, %v1076_v6  ;;  %v394_v9 = vld [vmem:[#allocation5] sm:$0xff]  ;;  %v390_v11 = vld [vmem:[#allocation4] sm:$0xff]  ;;  %v957_v13 = vmov 0  }
  0x37   : > { %v356_v14 = vsel %vm355_vm0, 1, %v957_v13  ;;  %v958_v15 = vmov 0.0   ;;  %v386_v18 = vld [vmem:[#allocation3] sm:$0xff]  ;;  %v371_v28 = vsub.f32 0.0, %v1062_v4  ;;  %v382_v39 = vld [vmem:[#allocation2] sm:$0xff] }
  0x38   : > { %v359_v10 = vsub.f32 0.0, %v358_v7  ;;  %v380_v12 = vmul.f32 %v379_v8, %v379_v8  ;;  %v665_v16 = vsel %vm355_vm0, 1.0, %v958_v15  ;;  %v395_v19 = vadd.s32 %v394_v9, %v356_v14 }
  0x39   : > { %v372_v31 = vmax.f32 %v371_v28, 0.0  ;;  %v376_v32 = vsub.f32 1.0, %v665_v16  ;;  %v374_v34 = vadd.f32 1.0, %v665_v16 }
  0x3a   : > { %v360_v17 = vmul.f32 1.442695, %v359_v10  ;;  %v381_v20 = vmul.f32 %v665_v16, %v380_v12  ;;  %v392_v21 = vadd.f32 %v390_v11, %v380_v12  ;;  %396 = vst [vmem:[#allocation5] sm:$0xff] %v395_v19 }
  0x3b   : > { %v377_v37 = vmul.f32 %v376_v32, %v1062_v4 }
  0x3c   : > { %794 = vpow2.f32 %v360_v17  ;;  %v388_v22 = vadd.f32 %v386_v18, %v381_v20  ;;  %393 = vst [vmem:[#allocation4] sm:$0xff] %v392_v21 }
  0x3e   : > { %389 = vst [vmem:[#allocation3] sm:$0xff] %v388_v22 }
  0x49   : > { %v795_v23 = vpop.eup %794 }
  0x4a   : > { %v362_v24 = vadd.f32 1.0, %v795_v23  ;;  %v365_v25 = vmul.f32 -0.5, %v795_v23  ;;  %v368_v27 = vand.u32 2147483647, %v795_v23 }
  0x4c   : > { %796 = vlog2.f32 %v362_v24  ;;  %v366_v26 = vadd.f32 1.0, %v365_v25  ;;  %vm369_vm1 = vcmp.lt.f32.partialorder %v368_v27, 0.0004427343 }
  0x4e   : > { %v367_v29 = vmul.f32 %v795_v23, %v366_v26 }
  0x59   : > { %v797_v30 = vpop.eup %796 }
  0x5a   : > { %v364_v33 = vmul.f32 0.6931472, %v797_v30 }
  0x5c   : > { %v370_v35 = vsel %vm369_vm1, %v367_v29, %v364_v33 }
  0x5d   : > { %v373_v36 = vadd.f32 %v372_v31, %v370_v35 }
  0x5f   : > { %v375_v38 = vmul.f32 %v374_v34, %v373_v36 }
  0x61   : > { %v378_v40 = vadd.f32 %v377_v37, %v375_v38 }
  0x63   : > { %v384_v41 = vadd.f32 %v382_v39, %v378_v40 }
  0x65   : > { %385 = vst [vmem:[#allocation2] sm:$0xff] %v384_v41 }
  0x66 PF: > { %p666_p6 = scmp.le.s32.totalorder %s1070_s27, 300 }
  0x67   : > { %s401_s9 = ssub.s32 (!%p666_p6), 300, %s662_s15 }
  0x68   : > { %400 = sbr.rel (%p666_p6) target bundleno = 158 (0x9e), region = 81 }
  0x6d   : > { %v402_v42 = vlaneseq  ;;  %v413_v43 = vand.u32 2147483647, %v1062_v4  ;;  %vm410_vm2 = vcmp.gt.f32.partialorder %v1076_v6, -20.0  ;;  %v434_v44 = vsub.f32 %v1064_v5, %v1076_v6  ;;  %v443_v56 = vld [vmem:[#allocation3] sm:$0xff]  ;;  %v448_v57 = vld [vmem:[#allocation4] sm:$0xff]  ;;  %v454_v59 = vld [vmem:[#allocation5] sm:$0xff] }
  0x6e   : > { %v959_v50 = vmov 0.0   ;;  %v408_v53 = vstv %s401_s9  ;;  %v960_v0 = vmov 0   ;;  %v426_v10 = vsub.f32 0.0, %v1062_v4  ;;  %v438_v21 = vld [vmem:[#allocation2] sm:$0xff] }
  0x6f   : > { %v403_v45 = vshrl.u32 %v402_v42, 7  ;;  %v405_v46 = vand.u32 127, %v402_v42  ;;  %v414_v47 = vsub.f32 0.0, %v413_v43  ;;  %v435_v48 = vmul.f32 %v434_v44, %v434_v44 }
  0x70   : > { %v667_v51 = vsel %vm410_vm2, 1.0, %v959_v50  ;;  %v427_v12 = vmax.f32 %v426_v10, 0.0 }
  0x71   : > { %v406_v49 = vmul.u32 128, %v403_v45  ;;  %v415_v52 = vmul.f32 1.442695, %v414_v47  ;;  %v436_v54 = vmul.f32 %v667_v51, %v435_v48  ;;  %v431_v13 = vsub.f32 1.0, %v667_v51 }
  0x72   : > { %v429_v15 = vadd.f32 1.0, %v667_v51 }
  0x73   : > { %v407_v55 = vadd.s32 %v406_v49, %v405_v46  ;;  %798 = vpow2.f32 %v415_v52  ;;  %v432_v18 = vmul.f32 %v431_v13, %v1062_v4 }
  0x75   : > { %vm1098_vm3 = vcmp.lt.s32.totalorder %v407_v55, %v408_v53 }
  0x76   : > { %v442_v60 = vsel %vm1098_vm3, %v436_v54, 0.0  ;;  %v447_v61 = vsel %vm1098_vm3, %v435_v48, 0.0  ;;  %vm452_vm4 = vmand %vm1098_vm3, %vm410_vm2 }
  0x77   : > { %v445_v62 = vadd.f32 %v443_v56, %v442_v60  ;;  %v450_v63 = vadd.f32 %v448_v57, %v447_v61  ;;  %v453_v1 = vsel %vm452_vm4, 1, %v960_v0 }
  0x78   : > { %v455_v2 = vadd.s32 %v454_v59, %v453_v1 }
  0x79   : > { %446 = vst [vmem:[#allocation3] sm:$0xff] %v445_v62  ;;  %451 = vst [vmem:[#allocation4] sm:$0xff] %v450_v63 }
  0x7a   : > { %456 = vst [vmem:[#allocation5] sm:$0xff] %v455_v2 }
  0x80   : > { %v799_v3 = vpop.eup %798 }
  0x81   : > { %v417_v5 = vadd.f32 1.0, %v799_v3  ;;  %v420_v7 = vmul.f32 -0.5, %v799_v3  ;;  %v423_v9 = vand.u32 2147483647, %v799_v3 }
  0x83   : > { %800 = vlog2.f32 %v417_v5  ;;  %v421_v8 = vadd.f32 1.0, %v420_v7  ;;  %vm424_vm5 = vcmp.lt.f32.partialorder %v423_v9, 0.0004427343 }
  0x85   : > { %v422_v6 = vmul.f32 %v799_v3, %v421_v8 }
  0x90   : > { %v801_v11 = vpop.eup %800 }
  0x91   : > { %v419_v14 = vmul.f32 0.6931472, %v801_v11 }
  0x93   : > { %v425_v16 = vsel %vm424_vm5, %v422_v6, %v419_v14 }
  0x94   : > { %v428_v17 = vadd.f32 %v427_v12, %v425_v16 }
  0x96   : > { %v430_v19 = vmul.f32 %v429_v15, %v428_v17 }
  0x98   : > { %v433_v20 = vadd.f32 %v432_v18, %v430_v19 }
  0x9a   : > { %v437_v22 = vsel %vm1098_vm3, %v433_v20, 0.0 }
  0x9b   : > { %v440_v23 = vadd.f32 %v438_v21, %v437_v22 }
  0x9d   : > { %441 = vst [vmem:[#allocation2] sm:$0xff] %v440_v23 }
  0x9e PF: > { %v462_v25 = vld [vmem:[#allocation3] sm:$0xff]  ;;  %v465_v4 = vld [vmem:[#allocation4] sm:$0xff]  ;;  %s677_s10 = smul.u32 384, %s929_s16  ;;  %v468_v26 = vld [vmem:[#allocation5] sm:$0xff]  ;;  %s489_s19 = sshll.u32 %s1078_s7, 4  ;;  %s1125_s19 = int_to_ptr.vmem [resolvable:$true] %s489_s19 }
  0x9f   : > { %668 = vst [vmem:[%s1078_s7 + $0x8] sm:$0xff] %v462_v25  ;;  %669 = vst [vmem:[%s1078_s7 + $0x10] sm:$0xff] %v465_v4  ;;  %s471_s15 = scalar_lea.sflag [#allocation8], %s1058_s11  ;;  %s802_s27 = scalar_lea.vmem %s1125_s19, 384 }
  0xa0   : > { %469 = vst [vmem:[%s1080_s8] sm:$0xff] %v468_v26  ;;  %s1123_s23 = scalar_lea.hbm %s1195_s2, %s677_s10  ;;  %p803_p7 = scmp.ne.s32.totalorder %s1125_s19, %s802_s27 }
  0xa1   : > { %s961_s28 = smov [#allocation7]  }
  0xa2   : > { %p804_p9 = pnand %p803_p7, %p1037_p8  ;;  %s806_s29 = sshll.u32 %s961_s28, 4  ;;  %s807_s29 = int_to_ptr.vmem [resolvable:$false] %s806_s29 }
  0xa3   : > { %s808_s30 = scalar_lea.vmem %s807_s29, 768  ;;  %p809_p13 = scmp.lt.s32.totalorder %s1125_s19, %s807_s29 }
  0xa4   : > { %v460_v24 = vld [vmem:[#allocation2] sm:$0xff]  ;;  %p805_p12 = pneg %p804_p9  ;;  %p810_p0 = scmp.lt.s32.totalorder %s808_s30, %s802_s27 }
  0xa5   : > { %461 = vst [vmem:[%s1078_s7] sm:$0xff] %v460_v24 }
  0xa6   : > { %p811_p1 = por %p810_p0, %p809_p13 }
  0xa8   : > { %p812_p2 = pnand %p811_p1, %p805_p12 }
  0xaa   : > { %815 = shalt.err (!%p812_p2)
}
  0xab   : > { %s816_s4 = scalar_lea.hbm %s1123_s23, 384  ;;  %s820_s7 = scalar_lea.hbm %s1195_s2, 768 }
  0xac   : > { %p817_p3 = scmp.ne.s32.totalorder %s1123_s23, %s816_s4  ;;  %p821_p6 = scmp.lt.s32.totalorder %s1123_s23, %s1195_s2 }
  0xad   : > { %p822_p7 = scmp.lt.s32.totalorder %s820_s7, %s816_s4 }
  0xae   : > { %p818_p4 = pnand %p817_p3, %p1037_p8 }
  0xaf   : > { %p823_p9 = por %p822_p7, %p821_p6 }
  0xb0   : > { %p819_p5 = pneg %p818_p4 }
  0xb2   : > { %p824_p12 = pnand %p823_p9, %p819_p5 }
  0xb4   : > { %827 = shalt.err (!%p824_p12)
}
  0xb5   : > { %s962_s20 = smov 128   ;;  %s963_s22 = smov 8  }
  0xb6   : > { %678 = dma.vmem_to_hbm [thread:$0]  (%p1037_p8), %s1125_s19, 384, %s1123_s23, %s471_s15, %s962_s20, %s962_s20, %s963_s22  }
  0xb7   : > { %s672_s27 = sshll.u32 %s929_s16, 7  ;;  %s505_s28 = sshll.u32 %s1080_s8, 4  ;;  %s506_s28 = int_to_ptr.vmem [resolvable:$true] %s505_s28 }
  0xb8   : > { %s503_s4 = scalar_lea.hbm %s1196_s3, %s672_s27  ;;  %s476_s5 = scalar_lea.sflag [#allocation10], %s1058_s11 }
  0xb9   : > { %s828_s6 = scalar_lea.vmem %s506_s28, 128  ;;  %s964_s7 = smov [#allocation9]  }
  0xba   : > { %p829_p13 = scmp.ne.s32.totalorder %s506_s28, %s828_s6  ;;  %s832_s9 = sshll.u32 %s964_s7, 4  ;;  %s833_s9 = int_to_ptr.vmem [resolvable:$false] %s832_s9 }
  0xbb   : > { %s834_s10 = scalar_lea.vmem %s833_s9, 256  ;;  %p835_p2 = scmp.lt.s32.totalorder %s506_s28, %s833_s9 }
  0xbc   : > { %p830_p0 = pnand %p829_p13, %p1037_p8  ;;  %p836_p3 = scmp.lt.s32.totalorder %s834_s10, %s828_s6 }
  0xbe   : > { %p831_p1 = pneg %p830_p0  ;;  %p837_p4 = por %p836_p3, %p835_p2 }
  0xc0   : > { %p838_p5 = pnand %p837_p4, %p831_p1 }
  0xc2   : > { %841 = shalt.err (!%p838_p5)
}
  0xc3   : > { %s842_s16 = scalar_lea.hbm %s503_s4, 128  ;;  %s846_s19 = scalar_lea.hbm %s1196_s3, 256 }
  0xc4   : > { %p843_p6 = scmp.ne.s32.totalorder %s503_s4, %s842_s16  ;;  %p847_p12 = scmp.lt.s32.totalorder %s503_s4, %s1196_s3 }
  0xc5   : > { %p848_p13 = scmp.lt.s32.totalorder %s846_s19, %s842_s16 }
  0xc6   : > { %p844_p7 = pnand %p843_p6, %p1037_p8 }
  0xc7   : > { %p849_p0 = por %p848_p13, %p847_p12 }
  0xc8   : > { %p845_p9 = pneg %p844_p7 }
  0xca   : > { %p850_p11 = pnand %p849_p0, %p845_p9 }
  0xcc   : > { %853 = shalt.err (!%p850_p11)
}
  0xcd   : > { %679 = dma.vmem_to_hbm [thread:$0]  (%p1037_p8), %s506_s28, 128, %s503_s4, %s476_s5  }
  0xce PF: > { %s517_s20 = sand.u32 1, %s913_s12   ;;  %p1202_p1 = scmp.ge.s32.totalorder %s937_s18, 2 }
  0xcf   : > { %s518_s22 = scalar_lea.sflag [#allocation8], %s517_s20 }
  0xd0   : > { %p683_p2 = pnand %p1202_p1, %p1041_p10 }
  0xd2   : > { %p684_p3 = pneg %p683_p2 }
  0xd4   : > { %903 = dma.done.wait (%p684_p3), %s518_s22, 384  }
  0xd5   : > { %905 = vsyncadd (%p684_p3), %s518_s22, 4294966912  ;;  %s527_s27 = scalar_lea.sflag [#allocation10], %s517_s20 }
  0xd6   : > { %907 = dma.done.wait (%p684_p3), %s527_s27, 128  }
  0xd7   : > { %909 = vsyncadd (%p684_p3), %s527_s27, 4294967168  ;;  %s20_s18 = sadd.s32 1, %s937_s18   ;;  %s1203_s12 = smov %s917_s13 }
  0xd8   : > { %p17_p11 = scmp.ge.s32.totalorder %s20_s18, 4   ;;  %s1204_s13 = smov %s921_s14 }
  0xd9   : > { %s1205_s14 = smov %s1035_s24  ;;  %s1183_s15 = smov 0  }
  0xda   : > { %s1206_s16 = smov %s933_s17  ;;  %s1207_s17 = smov %s1209_s21 }
  0xdb   :  { %19 = sbr.rel (!%p17_p11) target bundleno = 7 (0x7), region = 161 }
  0xe0   :  { %532 = vsyncpa [#allocation8], 1 }
  0xe1   :  { %534 = vsyncpa [#allocation8 + $0x1], 1 }
  0xe2   :  { %535 = vsyncpa [#allocation10], 1 }
  0xe3   :  { %537 = vsyncpa [#allocation10 + $0x1], 1 }

</bundles_post_ra>
